<compile_context>
chip_gen: v7x
topology: tpu7x:2x2x1
jax: 0.10.0
libtpu: 0.0.40
codegen_flags: <defaults>
</compile_context>

<pallas_src>
import functools

import jax
import jax.numpy as jnp
from jax.experimental import pallas as pl
from jax.experimental.pallas import tpu as pltpu

_LANE = 128
_SUB = 8


def _cdiv(a, b):
    return -(-a // b)


def _round_up(a, b):
    return _cdiv(a, b) * b


def _vmem_capacity_bytes():
    try:
        return int(pltpu.get_tpu_info().vmem_capacity_bytes)
    except Exception:
        return 64 * 1024 * 1024  # conservative default (v7x per-TC size); safe everywhere


def _focal_loss_tile_kernel(pred_ref, label_ref, mask_ref, out_ref, *,
                            alpha: float, gamma: float):
    """One (b, spatial-tile) block: sigmoid focal loss, masked, reduced to an (8,128) partial."""
    x = pred_ref[0].astype(jnp.float32)   # (C, r_tile, 128) logits
    y = label_ref[0].astype(jnp.float32)  # (C, r_tile, 128) targets in {0,1}
    m = mask_ref[0].astype(jnp.float32)   # (r_tile, 128) visibility mask (shared across C)

    # Shared exp: e = exp(-|x|) feeds both the stable BCE-with-logits and sigmoid(x).
    e = jnp.exp(-jnp.abs(x))                                    # EUP exp (once)
    ce = jnp.maximum(x, 0.0) - x * y + jnp.log1p(e)             # EUP log1p
    inv = 1.0 / (1.0 + e)                                       # exact divide (keeps f32 parity)
    p = jnp.where(x >= 0.0, 1.0, e) * inv                       # == sigmoid(x)

    p_t = p * y + (1.0 - p) * (1.0 - y)
    t = 1.0 - p_t

    # (1 - p_t) ** gamma: integer gamma (default 2.0) -> VPU multiplies, no pow/exp/log.
    g = float(gamma)
    if g == int(g) and 0 <= int(g) <= 8:
        gi = int(g)
        w = jnp.ones_like(t) if gi == 0 else t
        for _ in range(max(gi - 1, 0)):
            w = w * t
    else:
        w = jnp.power(t, g)  # fallback for non-integer gamma

    loss = ce * w

    if float(alpha) >= 0.0:  # alpha = -1.0 by default -> static Python branch skipped
        a = float(alpha)
        loss = (a * y + (1.0 - a) * (1.0 - y)) * loss

    masked = loss * m[None, :, :]  # broadcast mask over the channel axis

    # Reduce (C, r_tile, 128) -> (8, 128): group sublane rows in packs of 8 and add the
    # resulting vregs elementwise on the VPU (no cross-lane XLU reduce inside the kernel).
    C, R, L = masked.shape
    partial = jnp.sum(masked.reshape((C * R) // _SUB, _SUB, L), axis=0)
    out_ref[0, 0] = partial


def binary_segmentation_loss(pred, batch, *, label_indices=None,
                             min_visibility=None, alpha=-1.0, gamma=2.0):
    """JAX/Pallas equivalent of BinarySegmentationLoss.forward."""
    if isinstance(pred, dict):
        pred = pred['bev']
    label = batch['bev']

    # label_indices: per-group max over selected label channels (plain-JAX glue).
    if label_indices is not None:
        groups = [jnp.max(label[:, jnp.asarray(idx)], axis=1, keepdims=True)
                  for idx in label_indices]
        label = jnp.concatenate(groups, axis=1)

    B, C, H, W = pred.shape
    assert label.shape == (B, C, H, W)
    HW = H * W

    if min_visibility is not None:
        mask = (batch['visibility'] >= min_visibility).astype(jnp.float32)  # (B, H, W)
    else:
        mask = jnp.ones((B, H, W), jnp.float32)

    # Denominator hoisted out of the kernel (O(B*HW), trivial) + empty-mask guard.
    count = jnp.sum(mask) * float(C)
    denom = jnp.maximum(count, 1.0)

    # ---- spatial tiling, sized from this generation's VMEM capacity ----
    rows_needed = _cdiv(HW, _LANE)
    rows_ceil = _round_up(rows_needed, _SUB)

    vmem_bytes = _vmem_capacity_bytes()
    # Conservative per-sublane-row working-set estimate:
    #   double-buffered DMA blocks (pred + label + mask) + f32 elementwise temporaries.
    dma_row = 2 * _LANE * (C * pred.dtype.itemsize + C * label.dtype.itemsize + 4)
    tmp_row = 10 * C * _LANE * 4   # ~10 live f32 temps per element inside the kernel
    budget = vmem_bytes // 4
    r_tile = max(_SUB, ((budget // (dma_row + tmp_row)) // _SUB) * _SUB)
    r_tile = min(r_tile, rows_ceil, 4096)

    num_tiles = _cdiv(rows_needed, r_tile)
    rows_pad = num_tiles * r_tile
    hw_pad = rows_pad * _LANE

    vmem_limit = int(min(int(vmem_bytes * 0.85),
                         max(32 * 1024 * 1024,
                             r_tile * (dma_row + tmp_row) + (16 << 20))))

    # ---- lane+sublane-dense relayout (native dtypes; kernel casts to f32 on load) ----
    pred_r = pred.reshape(B, C, HW)
    label_r = label.reshape(B, C, HW)
    mask_r = mask.reshape(B, HW)
    if hw_pad != HW:
        pad = hw_pad - HW
        pred_r = jnp.pad(pred_r, ((0, 0), (0, 0), (0, pad)))
        label_r = jnp.pad(label_r, ((0, 0), (0, 0), (0, pad)))
        mask_r = jnp.pad(mask_r, ((0, 0), (0, pad)))   # padded pixels masked out -> contribute 0
    pred_t = pred_r.reshape(B, C, rows_pad, _LANE)
    label_t = label_r.reshape(B, C, rows_pad, _LANE)
    mask_t = mask_r.reshape(B, rows_pad, _LANE)

    kernel = functools.partial(_focal_loss_tile_kernel,
                               alpha=float(alpha), gamma=float(gamma))

    partials = pl.pallas_call(
        kernel,
        out_shape=jax.ShapeDtypeStruct((B, num_tiles, _SUB, _LANE), jnp.float32),
        grid=(B, num_tiles),
        in_specs=[
            pl.BlockSpec((1, C, r_tile, _LANE), lambda b, t: (b, 0, t, 0)),
            pl.BlockSpec((1, C, r_tile, _LANE), lambda b, t: (b, 0, t, 0)),
            pl.BlockSpec((1, r_tile, _LANE), lambda b, t: (b, t, 0)),
        ],
        out_specs=pl.BlockSpec((1, 1, _SUB, _LANE), lambda b, t: (b, t, 0, 0)),
        compiler_params=pltpu.CompilerParams(
            dimension_semantics=("parallel", "parallel"),
            vmem_limit_bytes=vmem_limit),
    )(pred_t, label_t, mask_t)

    # loss[mask[:, None]].mean() == sum(masked loss) / number of selected elements
    return jnp.sum(partials) / denom


def _reference_loss(pred, batch, *, label_indices, min_visibility, alpha, gamma):
    """Pure-JAX reference mirroring the PyTorch forward (for sanity checking)."""
    if isinstance(pred, dict):
        pred = pred['bev']
    label = batch['bev']
    if label_indices is not None:
        label = jnp.concatenate(
            [jnp.max(label[:, jnp.asarray(idx)], axis=1, keepdims=True)
             for idx in label_indices], axis=1)
    x, y = pred.astype(jnp.float32), label.astype(jnp.float32)
    ce = jnp.maximum(x, 0.0) - x * y + jnp.log1p(jnp.exp(-jnp.abs(x)))
    p = jax.nn.sigmoid(x)
    p_t = p * y + (1 - p) * (1 - y)
    loss = ce * (1 - p_t) ** gamma
    if alpha >= 0:
        loss = (alpha * y + (1 - alpha) * (1 - y)) * loss
    if min_visibility is not None:
        m = (batch['visibility'] >= min_visibility).astype(jnp.float32)[:, None]
        return jnp.sum(loss * m) / (jnp.sum(m) * loss.shape[1])
    return jnp.mean(loss)


if __name__ == "__main__":
    key = jax.random.PRNGKey(0)
    k1, k2, k3 = jax.random.split(key, 3)

    B, C_label, H, W = 2, 4, 16, 16
    label_indices = [[0, 1, 2, 3]]      # -> 1 prediction channel (as in CVT)
    min_visibility = 2

    pred_bev = jax.random.normal(k1, (B, len(label_indices), H, W), jnp.float32)
    bev = (jax.random.uniform(k2, (B, C_label, H, W)) > 0.7).astype(jnp.float32)
    visibility = jax.random.randint(k3, (B, H, W), 0, 4).astype(jnp.int32)

    pred = {'bev': pred_bev}
    batch = {'bev': bev, 'visibility': visibility}

    loss = binary_segmentation_loss(pred, batch,
                                    label_indices=label_indices,
                                    min_visibility=min_visibility,
                                    alpha=-1.0, gamma=2.0)
    loss = jax.block_until_ready(loss)

    ref = _reference_loss(pred, batch, label_indices=label_indices,
                          min_visibility=min_visibility, alpha=-1.0, gamma=2.0)
    assert jnp.allclose(loss, ref, rtol=1e-4, atol=1e-6), (loss, ref)

    print("KERNEL_OK")
</pallas_src>

<mosaic_0001>
module attributes {stable_mosaic.version = 11 : i64} {
  func.func @_focal_loss_tile_kernel(%arg0: i32, %arg1: i32, %arg2: memref<1x1x8x128xf32, #tpu.memory_space<vmem>>, %arg3: memref<1x1x8x128xf32, #tpu.memory_space<vmem>>, %arg4: memref<1x8x128xf32, #tpu.memory_space<vmem>>, %arg5: memref<1x1x8x128xf32, #tpu.memory_space<vmem>>) attributes {dimension_semantics = [#tpu.dimension_semantics<parallel>, #tpu.dimension_semantics<parallel>], iteration_bounds = array<i64: 2, 1>, scalar_prefetch = 0 : i64, scratch_operands = 0 : i64, tpu.core_type = #tpu.core_type<tc>, window_params = [{transform_indices = @transform_0, window_bounds = array<i64: 1, 1, 8, 128>}, {transform_indices = @transform_1, window_bounds = array<i64: 1, 1, 8, 128>}, {transform_indices = @transform_2, window_bounds = array<i64: 1, 8, 128>}, {transform_indices = @transform_3, window_bounds = array<i64: 1, 1, 8, 128>}]} {
    %c0 = arith.constant 0 : index
    %c0_0 = arith.constant 0 : index
    %c0_1 = arith.constant 0 : index
    %c0_2 = arith.constant 0 : index
    %0 = vector.load %arg2[%c0, %c0_0, %c0_1, %c0_2] : memref<1x1x8x128xf32, #tpu.memory_space<vmem>>, vector<1x1x8x128xf32>
    %1 = vector.shape_cast %0 : vector<1x1x8x128xf32> to vector<1x8x128xf32>
    %c0_3 = arith.constant 0 : index
    %c0_4 = arith.constant 0 : index
    %c0_5 = arith.constant 0 : index
    %c0_6 = arith.constant 0 : index
    %2 = vector.load %arg3[%c0_3, %c0_4, %c0_5, %c0_6] : memref<1x1x8x128xf32, #tpu.memory_space<vmem>>, vector<1x1x8x128xf32>
    %3 = vector.shape_cast %2 : vector<1x1x8x128xf32> to vector<1x8x128xf32>
    %c0_7 = arith.constant 0 : index
    %c0_8 = arith.constant 0 : index
    %c0_9 = arith.constant 0 : index
    %4 = vector.load %arg4[%c0_7, %c0_8, %c0_9] : memref<1x8x128xf32, #tpu.memory_space<vmem>>, vector<1x8x128xf32>
    %5 = vector.shape_cast %4 : vector<1x8x128xf32> to vector<8x128xf32>
    %6 = math.absf %1 : vector<1x8x128xf32>
    %cst = arith.constant 0.000000e+00 : f32
    %7 = vector.broadcast %cst : f32 to vector<1x8x128xf32>
    %8 = arith.subf %7, %6 : vector<1x8x128xf32>
    %9 = math.exp %8 : vector<1x8x128xf32>
    %cst_10 = arith.constant 0.000000e+00 : f32
    %10 = vector.broadcast %cst_10 : f32 to vector<1x8x128xf32>
    %11 = arith.maximumf %1, %10 : vector<1x8x128xf32>
    %12 = arith.mulf %1, %3 : vector<1x8x128xf32>
    %13 = arith.subf %11, %12 : vector<1x8x128xf32>
    %14 = math.log1p %9 : vector<1x8x128xf32>
    %15 = arith.addf %13, %14 : vector<1x8x128xf32>
    %cst_11 = arith.constant 1.000000e+00 : f32
    %16 = vector.broadcast %cst_11 : f32 to vector<1x8x128xf32>
    %17 = arith.addf %16, %9 : vector<1x8x128xf32>
    %cst_12 = arith.constant 1.000000e+00 : f32
    %18 = vector.broadcast %cst_12 : f32 to vector<1x8x128xf32>
    %19 = arith.divf %18, %17 : vector<1x8x128xf32>
    %cst_13 = arith.constant 0.000000e+00 : f32
    %20 = vector.broadcast %cst_13 : f32 to vector<1x8x128xf32>
    %21 = arith.cmpf oge, %1, %20 : vector<1x8x128xf32>
    %cst_14 = arith.constant 1.000000e+00 : f32
    %22 = vector.broadcast %cst_14 : f32 to vector<1x8x128xf32>
    %23 = arith.select %21, %22, %9 : vector<1x8x128xi1>, vector<1x8x128xf32>
    %24 = arith.mulf %23, %19 : vector<1x8x128xf32>
    %25 = arith.mulf %24, %3 : vector<1x8x128xf32>
    %cst_15 = arith.constant 1.000000e+00 : f32
    %26 = vector.broadcast %cst_15 : f32 to vector<1x8x128xf32>
    %27 = arith.subf %26, %24 : vector<1x8x128xf32>
    %cst_16 = arith.constant 1.000000e+00 : f32
    %28 = vector.broadcast %cst_16 : f32 to vector<1x8x128xf32>
    %29 = arith.subf %28, %3 : vector<1x8x128xf32>
    %30 = arith.mulf %27, %29 : vector<1x8x128xf32>
    %31 = arith.addf %25, %30 : vector<1x8x128xf32>
    %cst_17 = arith.constant 1.000000e+00 : f32
    %32 = vector.broadcast %cst_17 : f32 to vector<1x8x128xf32>
    %33 = arith.subf %32, %31 : vector<1x8x128xf32>
    %34 = arith.mulf %33, %33 : vector<1x8x128xf32>
    %35 = arith.mulf %15, %34 : vector<1x8x128xf32>
    %36 = vector.shape_cast %5 : vector<8x128xf32> to vector<1x8x128xf32>
    %37 = arith.mulf %35, %36 : vector<1x8x128xf32>
    %cst_18 = arith.constant dense<0.000000e+00> : vector<8x128xf32>
    %38 = vector.multi_reduction <add>, %37, %cst_18 [0] : vector<1x8x128xf32> to vector<8x128xf32>
    %c0_19 = arith.constant 0 : index
    %c0_20 = arith.constant 0 : index
    %c0_21 = arith.constant 0 : index
    %c0_22 = arith.constant 0 : index
    %39 = vector.load %arg5[%c0_19, %c0_20, %c0_21, %c0_22] : memref<1x1x8x128xf32, #tpu.memory_space<vmem>>, vector<1x1x8x128xf32>
    %40 = vector.shape_cast %39 : vector<1x1x8x128xf32> to vector<8x128xf32>
    %41 = vector.shape_cast %38 : vector<8x128xf32> to vector<1x1x8x128xf32>
    tpu.vector_store %arg5[%c0_19, %c0_20, %c0_21, %c0_22], %41 {strides = array<i32>} : memref<1x1x8x128xf32, #tpu.memory_space<vmem>>, vector<1x1x8x128xf32>,
    return
  }
  func.func @transform_0(%arg0: i32, %arg1: i32) -> (i32, i32, i32, i32) {
    %c0_i32 = arith.constant 0 : i32
    %c0_i32_0 = arith.constant 0 : i32
    %c0_i32_1 = arith.constant 0 : i32
    return %arg0, %c0_i32, %arg1, %c0_i32_0 : i32, i32, i32, i32
  }
  func.func @transform_1(%arg0: i32, %arg1: i32) -> (i32, i32, i32, i32) {
    %c0_i32 = arith.constant 0 : i32
    %c0_i32_0 = arith.constant 0 : i32
    %c0_i32_1 = arith.constant 0 : i32
    return %arg0, %c0_i32, %arg1, %c0_i32_0 : i32, i32, i32, i32
  }
  func.func @transform_2(%arg0: i32, %arg1: i32) -> (i32, i32, i32) {
    %c0_i32 = arith.constant 0 : i32
    %c0_i32_0 = arith.constant 0 : i32
    return %arg0, %arg1, %c0_i32 : i32, i32, i32
  }
  func.func @transform_3(%arg0: i32, %arg1: i32) -> (i32, i32, i32, i32) {
    %c0_i32 = arith.constant 0 : i32
    %c0_i32_0 = arith.constant 0 : i32
    %c0_i32_1 = arith.constant 0 : i32
    return %arg0, %arg1, %c0_i32, %c0_i32_0 : i32, i32, i32, i32
  }
}

</mosaic_0001>

<bundles_post_ra>
// kernel: tpu_custom_call.1
= control target key start
LH: loop header
LB: loop body
LE: loop exit
PB: predicated region body
PF: predicated region fallthrough
CT: control target
= control target key end

     0   :  { %s1020_s0 = inlined_call_operand.hbm [shape: f32[2,1,8,128], index: 0, kind: input, shape index: {}]   ;;  %s1021_s1 = inlined_call_operand.hbm [shape: f32[2,1,8,128], index: 1, kind: input, shape index: {}]   ;;  %s1022_s2 = inlined_call_operand.hbm [shape: f32[2,8,128], index: 2, kind: input, shape index: {}]   ;;  %s1023_s3 = inlined_call_operand.hbm [shape: f32[2,1,8,128], index: 3, kind: output, shape index: {}]  }
   0x1   :  { %1029 = sst [smem:[#allocation15_spill]] %s1021_s1 }
   0x2   :  { %8 = vsyncpa [#allocation3], 0 }
   0x3   :  { %10 = vsyncpa [#allocation3 + $0x1], 0 }
   0x4   :  { %11 = vsyncpa [#allocation6], 0 }
   0x5   :  { %13 = vsyncpa [#allocation6 + $0x1], 0 }
   0x6   :  { %14 = vsyncpa [#allocation4], 0 }
   0x7   :  { %16 = vsyncpa [#allocation4 + $0x1], 0  ;;  %s756_s12 = smov 0   ;;  %s758_s13 = smov 0  }
   0x8   :  { %s760_s14 = smov 0   ;;  %s762_s15 = smov 0  }
   0x9   :  { %s764_s16 = smov 0   ;;  %s766_s17 = smov 0  }
   0xa LB: > { %1030 = sst [smem:[#allocation12_spill]] %s726_s16  ;;  %s787_s18 = sadd.s32 4294967295, %s730_s17   ;;  %s730_s17 = sphi %s766_s17, %s22_s17   ;;  %s726_s16 = sphi %s764_s16, %s1051_s16   ;;  %s722_s15 = sphi %s762_s15, %s1050_s15   ;;  %s718_s14 = sphi %s760_s14, %s1054_s14   ;;  %s714_s13 = sphi %s758_s13, %s1053_s13   ;;  %s710_s12 = sphi %s756_s12, %s1052_s12  }
   0xb   : > { %s458_s19 = sadd.s32 4294967294, %s730_s17   ;;  %s34_s20 = sadd.s32 1, %s726_s16 }
   0xc   : > { %s43_s21 = sadd.s32 1, %s718_s14  ;;  %p36_p0 = scmp.ge.s32.totalorder %s34_s20, 2 }
   0xd   : > { %p50_p1 = scmp.ne.s32.totalorder %s718_s14, %s714_s13  ;;  %p51_p2 = scmp.eq.s32.totalorder %s730_s17, 0 }
   0xe   : > { %p56_p3 = scmp.ne.s32.totalorder %s714_s13, %s710_s12  ;;  %s1056_s20 = smov (%p36_p0, %s34_s20), 0 }
   0xf   : > { %1031 = sst [smem:[#allocation13_spill]] %s1056_s20  ;;  %p799_p4 = por %p51_p2, %p50_p1 }
  0x10   : > { %p57_p5 = scmp.eq.s32.totalorder %s787_s18, 0  ;;  %s38_s23 = ssub.s32 %s726_s16, %s1056_s20 }
  0x11   : > { %p138_p6 = scmp.eq.s32.totalorder %s787_s18, 1  ;;  %p41_p7 = scmp.eq.s32.totalorder %s38_s23, 0 }
  0x12   : > { %p807_p8 = por %p57_p5, %p56_p3  ;;  %p144_p10 = scmp.eq.s32.totalorder %s458_s19, 1 }
  0x13   : > { %p811_p9 = por %p138_p6, %p50_p1  ;;  %p498_p13 = scmp.lt.s32.totalorder %s730_s17, 2 }
  0x14   : > { %s1033_s24 = scalar_select %p807_p8, 1, 0 }
  0x15   : > { %s1034_s25 = scalar_select %p811_p9, 1, 0 }
  0x16   : > { %s816_s26 = scalar_select %p41_p7, %s718_s14, %s43_s21  }
  0x17   : > { %p818_p11 = por %p144_p10, %p56_p3  ;;  %s164_s28 = sand.u32 1, %s718_s14  }
  0x18   : > { %1035 = sst [smem:[#allocation14_spill]] %s816_s26  ;;  %s827_s29 = sshll.u32 %s164_s28, 3 }
  0x19   : > { %s1036_s27 = scalar_select %p818_p11, 1, 0 }
  0x1a   : > { %s830_s30 = sshll.u32 %s726_s16, 7  ;;  %p834_p0 = pnand %p498_p13, %p799_p4 }
  0x1b   : > { %s183_s5 = sand.u32 1, %s730_s17   ;;  %s1038_s1 = sld [smem:[#allocation15_spill]] }
  0x1c   : > { %s1037_s4 = scalar_select %p834_p0, 1, 0 }
  0x1d   : > { %s187_s9 = scalar_lea.vmem [#allocation5], %s827_s29  ;;  %s850_s11 = scalar_lea.sflag [#allocation6], %s183_s5 }
  0x1e   : > { %s195_s10 = sshll.u32 %s187_s9, 4  ;;  %p856_p4 = pneg %p834_p0  ;;  %s847_s10 = int_to_ptr.vmem [resolvable:$true] %s195_s10 }
  0x21   : > { %s843_s8 = scalar_lea.hbm %s1038_s1, %s830_s30  ;;  %s559_s6 = scalar_lea.hbm %s1038_s1, 256 }
  0x22   : > { %s554_s19 = scalar_lea.hbm %s843_s8, 128  ;;  %p560_p7 = scmp.lt.u32.totalorder %s843_s8, %s1038_s1 }
  0x23   : > { %p555_p3 = scmp.ne.s32.totalorder %s843_s8, %s554_s19  ;;  %p561_p10 = scmp.lt.u32.totalorder %s559_s6, %s554_s19 }
  0x24   : > { %p563_p12 = scmp.lt.u32.totalorder %s554_s19, %s843_s8 }
  0x25   : > { %p557_p5 = pnand %p856_p4, %p555_p3  ;;  %p562_p13 = por %p561_p10, %p560_p7 }
  0x27   : > { %p558_p6 = pneg %p557_p5  ;;  %p564_p1 = por %p563_p12, %p562_p13 }
  0x29   : > { %p565_p2 = pnand %p564_p1, %p558_p6 }
  0x2b   : > { %568 = shalt.err (!%p565_p2)
}
  0x2c   : > { %s569_s5 = scalar_lea.vmem %s847_s10, 128  ;;  %s732_s22 = smov [#allocation5]  }
  0x2d   : > { %p570_p3 = scmp.ne.s32.totalorder %s847_s10, %s569_s5  ;;  %s574_s23 = sshll.u32 %s732_s22, 4  ;;  %s575_s23 = int_to_ptr.vmem [resolvable:$false] %s574_s23 }
  0x2e   : > { %s576_s7 = scalar_lea.vmem %s575_s23, 256  ;;  %p577_p9 = scmp.lt.s32.totalorder %s847_s10, %s575_s23 }
  0x2f   : > { %p572_p5 = pnand %p570_p3, %p856_p4  ;;  %p578_p8 = scmp.lt.s32.totalorder %s576_s7, %s569_s5 }
  0x31   : > { %p573_p11 = pneg %p572_p5  ;;  %p579_p7 = por %p578_p8, %p577_p9 }
  0x33   : > { %p580_p10 = pnand %p579_p7, %p573_p11 }
  0x35   : > { %583 = shalt.err (!%p580_p10)
}
  0x36   : > { %490 = dma.hbm_to_vmem [thread:$0]  (!%p834_p0), %s843_s8, 128, %s847_s10, %s850_s11  }
  0x37   : > { %p1040_p12 = scmp.lt.s32.totalorder %s730_s17, 3  ;;  %p1041_p1 = scmp.ge.s32.totalorder %s730_s17, 1 }
  0x38   : > { %s892_s5 = scalar_lea.hbm %s1020_s0, %s830_s30  ;;  %s168_s22 = scalar_lea.vmem [#allocation2], %s827_s29 }
  0x39   : > { %p884_p2 = pnand %p1041_p1, %p1040_p12  ;;  %s176_s23 = sshll.u32 %s168_s22, 4  ;;  %s895_s23 = int_to_ptr.vmem [resolvable:$true] %s176_s23 }
  0x3a   : > { %s901_s7 = scalar_lea.hbm %s1022_s2, %s830_s30  ;;  %s165_s1 = scalar_lea.sflag [#allocation3], %s164_s28 }
  0x3b   : > { %s1042_s19 = scalar_select %p884_p2, 1, 0 }
  0x3c   : > { %s584_s20 = scalar_lea.hbm %s892_s5, 128  ;;  %s589_s16 = scalar_lea.hbm %s1020_s0, 256 }
  0x3d   : > { %p585_p8 = scmp.ne.s32.totalorder %s892_s5, %s584_s20  ;;  %p590_p6 = scmp.lt.u32.totalorder %s892_s5, %s1020_s0 }
  0x3e   : > { %p591_p13 = scmp.lt.u32.totalorder %s589_s16, %s584_s20  ;;  %p593_p5 = scmp.lt.u32.totalorder %s584_s20, %s892_s5 }
  0x3f   : > { %p587_p9 = pnand %p585_p8, %p856_p4 }
  0x40   : > { %p592_p3 = por %p591_p13, %p590_p6 }
  0x41   : > { %p588_p11 = pneg %p587_p9 }
  0x42   : > { %p594_p7 = por %p593_p5, %p592_p3 }
  0x44   : > { %p595_p10 = pnand %p594_p7, %p588_p11 }
  0x46   : > { %598 = shalt.err (!%p595_p10)
}
  0x47   : > { %s599_s28 = scalar_lea.vmem %s895_s23, 128  ;;  %s733_s30 = smov [#allocation2]  }
  0x48   : > { %p600_p12 = scmp.ne.s32.totalorder %s895_s23, %s599_s28  ;;  %s604_s8 = sshll.u32 %s733_s30, 4  ;;  %s605_s8 = int_to_ptr.vmem [resolvable:$false] %s604_s8 }
  0x49   : > { %s606_s26 = scalar_lea.vmem %s605_s8, 256  ;;  %p607_p9 = scmp.lt.s32.totalorder %s895_s23, %s605_s8 }
  0x4a   : > { %p602_p1 = pnand %p600_p12, %p856_p4  ;;  %p608_p2 = scmp.lt.s32.totalorder %s606_s26, %s599_s28 }
  0x4c   : > { %p603_p8 = pneg %p602_p1  ;;  %p609_p6 = por %p608_p2, %p607_p9 }
  0x4e   : > { %p610_p13 = pnand %p609_p6, %p603_p8 }
  0x50   : > { %613 = shalt.err (!%p610_p13)
}
  0x51   : > { %487 = dma.hbm_to_vmem [thread:$0]  (!%p834_p0), %s892_s5, 128, %s895_s23, %s165_s1  }
  0x52   : > { %s206_s16 = scalar_lea.vmem [#allocation7], %s827_s29  ;;  %s614_s10 = scalar_lea.hbm %s901_s7, 128 }
  0x53   : > { %s214_s20 = sshll.u32 %s206_s16, 4  ;;  %p615_p11 = scmp.ne.s32.totalorder %s901_s7, %s614_s10  ;;  %s215_s20 = int_to_ptr.vmem [resolvable:$true] %s214_s20 }
  0x54   : > { %s619_s22 = scalar_lea.hbm %s1022_s2, 256  ;;  %p620_p5 = scmp.lt.u32.totalorder %s901_s7, %s1022_s2 }
  0x55   : > { %p617_p2 = pnand %p615_p11, %p856_p4  ;;  %p621_p7 = scmp.lt.u32.totalorder %s619_s22, %s614_s10 }
  0x56   : > { %p623_p12 = scmp.lt.u32.totalorder %s614_s10, %s901_s7 }
  0x57   : > { %p618_p3 = pneg %p617_p2  ;;  %p622_p10 = por %p621_p7, %p620_p5 }
  0x59   : > { %p624_p1 = por %p623_p12, %p622_p10 }
  0x5b   : > { %p625_p8 = pnand %p624_p1, %p618_p3 }
  0x5d   : > { %628 = shalt.err (!%p625_p8)
}
  0x5e   : > { %s629_s1 = scalar_lea.vmem %s215_s20, 128  ;;  %s734_s29 = smov [#allocation7]  }
  0x5f   : > { %p630_p9 = scmp.ne.s32.totalorder %s215_s20, %s629_s1  ;;  %s634_s5 = sshll.u32 %s734_s29, 4  ;;  %s635_s5 = int_to_ptr.vmem [resolvable:$false] %s634_s5 }
  0x60   : > { %s636_s23 = scalar_lea.vmem %s635_s5, 256  ;;  %p637_p11 = scmp.lt.s32.totalorder %s215_s20, %s635_s5 }
  0x61   : > { %p632_p6 = pnand %p630_p9, %p856_p4  ;;  %p638_p2 = scmp.lt.s32.totalorder %s636_s23, %s629_s1 }
  0x63   : > { %p633_p13 = pneg %p632_p6  ;;  %p639_p0 = por %p638_p2, %p637_p11 }
  0x65   : > { %p640_p5 = pnand %p639_p0, %p633_p13 }
  0x67   : > { %643 = shalt.err (!%p640_p5)
}
  0x68   : > { %p1043_p7 = scmp.ne.s32.totalorder %s1037_s4, 0  ;;  %p1044_p3 = scmp.ne.s32.totalorder %s1042_s19, 0 }
  0x69   : > { %s948_s21 = sand.u32 (!%p1044_p3), 1, %s714_s13   ;;  %p1045_p0 = scmp.ne.s32.totalorder (!%p1044_p3), %s1033_s24, 0 }
  0x6a   : > { %493 = dma.hbm_to_vmem [thread:$0]  (!%p1043_p7), %s901_s7, 128, %s215_s20, %s850_s11  }
  0x6b   : > { %223 = sbr.rel (%p1044_p3) target bundleno = 180 (0xb4), region = 32  ;;  %s951_s8 = sshll.u32 (!%p1044_p3), %s948_s21, 3 }
  0x6c   : > { %s226_s26 = scalar_lea.sflag (!%p1044_p3), [#allocation3], %s948_s21  ;;  %s229_s16 = scalar_lea.vmem (!%p1044_p3), [#allocation2], %s951_s8 }
  0x72   : > { %697 = dma.done.wait (%p1045_p0), %s226_s26, 128  }
  0x73   : > { %699 = vsyncadd (%p1045_p0), %s226_s26, 4294967168  ;;  %s234_s4 = sand.u32 1, %s787_s18   ;;  %s238_s19 = scalar_lea.vmem [#allocation5], %s951_s8 }
  0x74   : > { %s235_s11 = scalar_lea.sflag [#allocation6], %s234_s4 }
  0x75   : > { %701 = dma.done.wait (%p1045_p0), %s235_s11, 256  }
  0x76   : > { %703 = vsyncadd (%p1045_p0), %s235_s11, 4294967040  ;;  %v280_v0 = vld [vmem:[%s229_s16] sm:$0xff]  ;;  %v281_v7 = vld [vmem:[%s238_s19] sm:$0xff]  ;;  %s247_s18 = scalar_lea.vmem [#allocation7], %s951_s8  ;;  %s279_s24 = scalar_lea.vmem [#allocation8], %s951_s8 }
  0x77   : > { %v283_v1 = vand.u32 2147483647, %v280_v0  ;;  %vm303_vm0 = vcmp.ge.f32.partialorder %v280_v0, 0.0  ;;  %v287_v13 = vmax.f32 %v280_v0, 0.0  ;;  %v288_v14 = vmul.f32 %v281_v7, %v280_v0  ;;  %v282_v28 = vld [vmem:[%s247_s18] sm:$0xff]  ;;  %s332_s7 = sshll.u32 %s279_s24, 4  ;;  %s968_s7 = int_to_ptr.vmem [resolvable:$true] %s332_s7 }
  0x78   : > { %v308_v16 = vsub.f32 1.0, %v281_v7  ;;  %s473_s20 = sshll.u32 %s722_s15, 7  ;;  %s318_s22 = scalar_lea.sflag [#allocation4], %s948_s21 }
  0x79   : > { %v284_v2 = vsub.f32 0.0, %v283_v1  ;;  %v289_v21 = vsub.f32 %v287_v13, %v288_v14  ;;  %s973_s9 = scalar_lea.hbm %s1023_s3, %s473_s20  ;;  %s644_s28 = scalar_lea.vmem %s968_s7, 128 }
  0x7a   : > { %p645_p4 = scmp.ne.s32.totalorder %s968_s7, %s644_s28  ;;  %p1046_p10 = scmp.ne.s32.totalorder %s1034_s25, 0 }
  0x7b   : > { %v285_v3 = vmul.f32 1.442695, %v284_v2  ;;  %s735_s15 = smov [#allocation8]  }
  0x7c   : > { %p646_p12 = pnand %p645_p4, %p1046_p10  ;;  %s648_s30 = sshll.u32 %s735_s15, 4  ;;  %s649_s30 = int_to_ptr.vmem [resolvable:$false] %s648_s30 }
  0x7d   : > { %548 = vpow2.f32 %v285_v3  ;;  %s650_s1 = scalar_lea.vmem %s649_s30, 256  ;;  %p651_p8 = scmp.lt.s32.totalorder %s968_s7, %s649_s30 }
  0x7e   : > { %p647_p1 = pneg %p646_p12  ;;  %p652_p9 = scmp.lt.s32.totalorder %s650_s1, %s644_s28 }
  0x80   : > { %p653_p6 = por %p652_p9, %p651_p8 }
  0x82   : > { %p654_p13 = pnand %p653_p6, %p647_p1 }
  0x87   : > { %v549_v4 = vpop.eup %548 }
  0x88   : > { %v290_v5 = vadd.f32 1.0, %v549_v4  ;;  %v293_v6 = vmul.f32 -0.5, %v549_v4  ;;  %v304_v9 = vsel %vm303_vm0, 1.0, %v549_v4  ;;  %v296_v11 = vand.u32 2147483647, %v549_v4 }
  0x8a   : > { %550 = vlog2.f32 %v290_v5  ;;  %v294_v8 = vadd.f32 1.0, %v293_v6  ;;  %vm297_vm1 = vcmp.lt.f32.partialorder %v296_v11, 0.0004427343 }
  0x8b   : > { %552 = vrcp.f32 %v290_v5 }
  0x8c   : > { %v295_v18 = vmul.f32 %v549_v4, %v294_v8 }
  0x94   : > { %v551_v10 = vpop.eup %550 }
  0x95   : > { %v553_v12 = vpop.eup %552  ;;  %v292_v17 = vmul.f32 0.6931472, %v551_v10 }
  0x96   : > { %v305_v15 = vmul.f32 %v553_v12, %v304_v9 }
  0x97   : > { %v298_v23 = vsel %vm297_vm1, %v295_v18, %v292_v17 }
  0x98   : > { %v306_v19 = vmul.f32 %v305_v15, %v281_v7  ;;  %v307_v20 = vsub.f32 1.0, %v305_v15  ;;  %v299_v25 = vadd.f32 %v298_v23, %v289_v21 }
  0x9a   : > { %v309_v22 = vmul.f32 %v308_v16, %v307_v20 }
  0x9c   : > { %v310_v24 = vadd.f32 %v309_v22, %v306_v19 }
  0x9e   : > { %v311_v26 = vsub.f32 1.0, %v310_v24 }
  0xa0   : > { %v312_v27 = vmul.f32 %v311_v26, %v311_v26 }
  0xa2   : > { %v313_v29 = vmul.f32 %v312_v27, %v299_v25 }
  0xa4   : > { %v314_v30 = vmul.f32 %v313_v29, %v282_v28 }
  0xa6   : > { %316 = vst [vmem:[%s279_s24] sm:$0xff] %v314_v30 }
  0xa7   : > { %657 = shalt.err (!%p654_p13)
}
  0xa8   : > { %s658_s29 = scalar_lea.hbm %s973_s9, 128  ;;  %s662_s21 = scalar_lea.hbm %s1023_s3, 256 }
  0xa9   : > { %p659_p11 = scmp.ne.s32.totalorder %s973_s9, %s658_s29  ;;  %p663_p7 = scmp.lt.u32.totalorder %s973_s9, %s1023_s3 }
  0xaa   : > { %p664_p3 = scmp.lt.u32.totalorder %s662_s21, %s658_s29  ;;  %p666_p4 = scmp.lt.u32.totalorder %s658_s29, %s973_s9 }
  0xab   : > { %p660_p2 = pnand %p659_p11, %p1046_p10 }
  0xac   : > { %p665_p0 = por %p664_p3, %p663_p7 }
  0xad   : > { %p661_p5 = pneg %p660_p2 }
  0xae   : > { %p667_p12 = por %p666_p4, %p665_p0 }
  0xb0   : > { %p668_p1 = pnand %p667_p12, %p661_p5 }
  0xb2   : > { %671 = shalt.err (!%p668_p1)
}
  0xb3   : > { %482 = dma.vmem_to_hbm [thread:$0]  (%p1046_p10), %s968_s7, 128, %s973_s9, %s318_s22  }
  0xb4 PF: > { %s344_s16 = sand.u32 1, %s710_s12   ;;  %p1047_p8 = scmp.ne.s32.totalorder %s1036_s27, 0 }
  0xb5   : > { %p1048_p9 = scmp.ge.s32.totalorder %s730_s17, 2  ;;  %s345_s4 = scalar_lea.sflag [#allocation4], %s344_s16 }
  0xb7   : > { %p495_p6 = pnand %p1048_p9, %p1047_p8 }
  0xb9   : > { %705 = dma.done.wait (!%p495_p6), %s345_s4, 128  }
  0xba   : > { %707 = vsyncadd (!%p495_p6), %s345_s4, 4294967168  ;;  %s22_s17 = sadd.s32 1, %s730_s17   ;;  %s1049_s25 = sld [smem:[#allocation14_spill]] }
  0xbb   : > { %p19_p13 = scmp.ge.s32.totalorder %s22_s17, 4   ;;  %s1050_s15 = sld [smem:[#allocation12_spill]] }
  0xbc   : > { %s1051_s16 = sld [smem:[#allocation13_spill]]  ;;  %s1052_s12 = smov %s714_s13 }
  0xbd   : > { %s1053_s13 = smov %s718_s14  ;;  %21 = sbr.rel (!%p19_p13) target bundleno = 10 (0xa), region = 101 }
  0xc0   : > { %s1054_s14 = smov %s1049_s25 }
  0xc4   :  { %350 = vsyncpa [#allocation3], 1 }
  0xc5   :  { %352 = vsyncpa [#allocation3 + $0x1], 1 }
  0xc6   :  { %353 = vsyncpa [#allocation6], 1 }
  0xc7   :  { %355 = vsyncpa [#allocation6 + $0x1], 1 }
  0xc8   :  { %356 = vsyncpa [#allocation4], 1 }
  0xc9   :  { %358 = vsyncpa [#allocation4 + $0x1], 1 }

</bundles_post_ra>
